<compile_context>
chip_gen: v7x
topology: tpu7x:2x2x1
jax: 0.10.0
libtpu: 0.0.40
codegen_flags: <defaults>
</compile_context>

<pallas_src>
import jax
import jax.numpy as jnp
from jax.experimental import pallas as pl
from jax.experimental.pallas import tpu as pltpu

GROUPS = 4  # BasicConv in VisionRC/gcn_lib uses Conv2d(..., 1, groups=4)


def _round_up(a, b):
    return ((a + b - 1) // b) * b


def _fold_grouped_1x1(weight, groups):
    """Fold a grouped 1x1 Conv2d weight (Cout, Cin//groups, 1, 1) into a dense
    block-diagonal (Cin, Cout) matrix (exact)."""
    cout, cin_g = weight.shape[0], weight.shape[1]
    cin = cin_g * groups
    out_g = cout // groups
    w = weight[:, :, 0, 0].astype(jnp.float32)               # (Cout, cin_g)
    w_bd = jnp.zeros((cin, cout), jnp.float32)
    for g in range(groups):
        blk = w[g * out_g:(g + 1) * out_g, :]                 # (out_g, cin_g)
        w_bd = w_bd.at[g * cin_g:(g + 1) * cin_g,
                       g * out_g:(g + 1) * out_g].set(blk.T)
    return w_bd


def batched_index_select(x, idx):
    """x: (B, C, N, 1), idx: (B, Nq, K) -> (B, C, Nq, K). (reference gather, plain JAX)"""
    B, C, N, _ = x.shape
    xs = x[..., 0]
    b_ix = jnp.arange(B)[:, None, None, None]
    c_ix = jnp.arange(C)[None, :, None, None]
    n_ix = idx[:, None, :, :]
    return xs[b_ix, c_ix, n_ix]


def edgeconv_kernel(xj_ref, xc_ref, wj_ref, wc_ref, b_ref, o_ref):
    # xj_ref: (TM, K, Cp) bf16   gathered neighbor features
    # xc_ref: (TM, Cp)    bf16   center (own-node) features
    # wj_ref: (Cp, Coutp) bf16   W_bot          (acts on x_j)
    # wc_ref: (Cp, Coutp) bf16   W_top - W_bot  (acts on the K-invariant x_i term)
    # b_ref : (1, Coutp)  f32    bias
    # o_ref : (TM, Coutp) f32
    tm, k, cp = xj_ref.shape
    xj = xj_ref[...].reshape(tm * k, cp)                      # single clean 2-D MXU matmul
    yj = jnp.dot(xj, wj_ref[...], preferred_element_type=jnp.float32)       # (TM*K, Coutp) f32
    yj = jnp.max(yj.reshape(tm, k, -1), axis=1)               # max over neighbors K
    yc = jnp.dot(xc_ref[...], wc_ref[...], preferred_element_type=jnp.float32)  # (TM, Coutp) f32
    # bias + relu AFTER the K-max (exact: bias is K-invariant, relu is monotone)
    o_ref[...] = jnp.maximum(yc + yj + b_ref[...], 0.0).astype(o_ref.dtype)


def graph_conv2d_edge(x, edge_index, weight, bias, *, tile_m=None, feat_dtype=jnp.bfloat16):
    """EdgeConv2d forward.
    x: (B, C, N, 1) f32, edge_index: (2, B, N, K) int32,
    weight: (Cout, 2C//GROUPS, 1, 1), bias: (Cout,).  Returns (B, Cout, N, 1) f32.

    NOTE: assumes edge_index[1] (center ids) is constant along K, which is how
    VisionRC/gcn_lib dense knn graphs are constructed.
    """
    B, C, N, _ = x.shape
    K = edge_index.shape[-1]
    Cout = weight.shape[0]
    C2 = 2 * C
    if C2 % GROUPS != 0 or Cout % GROUPS != 0:
        raise ValueError(f"2*C ({C2}) and Cout ({Cout}) must be divisible by groups={GROUPS}")
    if weight.shape[1] != C2 // GROUPS:
        raise ValueError("weight shape inconsistent with grouped 1x1 conv on 2C input channels")

    # ---- fold grouped conv to block-diagonal (2C, Cout), then split (exact) -----------
    # cat([x_i, x_j - x_i]) @ W_bd == x_i @ (W_top - W_bot) + x_j @ W_bot
    w_bd = _fold_grouped_1x1(weight, GROUPS)                  # (2C, Cout)
    w_top, w_bot = w_bd[:C], w_bd[C:]
    w_ctr = w_top - w_bot                                     # applied to center features

    # ---- gathers (channels-last); center term computed once per node ------------------
    # TODO(synk): move the neighbor gather in-kernel (x resident in VMEM + scalar-prefetched
    # neighbor ids) to avoid materializing the (M, K, C) intermediate in HBM at all.
    xs_t = jnp.transpose(x[..., 0], (0, 2, 1))                # (B, N, C) channels-last
    b_ix = jnp.arange(B)[:, None, None]
    x_j = xs_t[b_ix, edge_index[0]]                           # (B, N, K, C) neighbors
    x_c = xs_t[jnp.arange(B)[:, None], edge_index[1][:, :, 0]]  # (B, N, C) centers

    M = B * N
    Cp = _round_up(C, 128)                                    # lane-dense channel padding
    Coutp = _round_up(Cout, 128)

    # ---- tile sizing: VMEM-budgeted, 8-aligned, padded M, grid >= 2 when possible -----
    row_bytes = K * Cp * 2 + Cp * 2 + Coutp * 4               # bf16 xj + bf16 xc + f32 out / row
    if tile_m is None:
        budget = 16 << 20                                     # double-buffered stream budget (v7x-safe)
        tile_m = max(8, min(1024, (budget // (2 * row_bytes)) // 8 * 8))
    tile_m = _round_up(min(tile_m, _round_up(M, 8)), 8)
    if _round_up(M, tile_m) // tile_m < 2 and _round_up(M, 8) >= 16:
        tile_m = _round_up((_round_up(M, 8) + 1) // 2, 8)     # keep >=2 grid steps (v7x megacore)
    M_pad = _round_up(M, tile_m)
    grid = (M_pad // tile_m,)

    # ---- pad + cast (bf16 streamed features, f32 MXU accumulation in-kernel) ----------
    xj = jnp.pad(x_j.reshape(M, K, C),
                 ((0, M_pad - M), (0, 0), (0, Cp - C))).astype(feat_dtype)
    xc = jnp.pad(x_c.reshape(M, C),
                 ((0, M_pad - M), (0, Cp - C))).astype(feat_dtype)
    wj = jnp.pad(w_bot, ((0, Cp - C), (0, Coutp - Cout))).astype(feat_dtype)
    wc = jnp.pad(w_ctr, ((0, Cp - C), (0, Coutp - Cout))).astype(feat_dtype)
    bp = jnp.pad(bias.astype(jnp.float32), (0, Coutp - Cout)).reshape(1, Coutp)

    blk_stream = tile_m * row_bytes
    const_bytes = 2 * Cp * Coutp * 2 + Coutp * 4
    vmem_limit = int(min(max(2 * blk_stream + 2 * const_bytes + (8 << 20), 32 << 20), 48 << 20))

    out = pl.pallas_call(
        edgeconv_kernel,
        out_shape=jax.ShapeDtypeStruct((M_pad, Coutp), jnp.float32),
        grid_spec=pltpu.PrefetchScalarGridSpec(
            num_scalar_prefetch=0,
            grid=grid,
            in_specs=[
                pl.BlockSpec((tile_m, K, Cp), lambda i: (i, 0, 0)),   # streamed neighbors
                pl.BlockSpec((tile_m, Cp), lambda i: (i, 0)),         # streamed centers
                pl.BlockSpec((Cp, Coutp), lambda i: (0, 0)),          # W_bot (resident)
                pl.BlockSpec((Cp, Coutp), lambda i: (0, 0)),          # W_top - W_bot (resident)
                pl.BlockSpec((1, Coutp), lambda i: (0, 0)),           # bias (resident)
            ],
            out_specs=pl.BlockSpec((tile_m, Coutp), lambda i: (i, 0)),
        ),
        compiler_params=pltpu.CompilerParams(
            dimension_semantics=("parallel",),
            vmem_limit_bytes=vmem_limit),
    )(xj, xc, wj, wc, bp)

    # back to PyTorch output layout (B, Cout, N, 1)
    return out[:M, :Cout].reshape(B, N, Cout).transpose(0, 2, 1)[..., None]


if __name__ == "__main__":
    B, C, N, K = 2, 4, 16, 8          # batch, in_channels, num_vertices, neighbors
    Cout = 8                          # out_channels

    key = jax.random.PRNGKey(0)
    kx, ke, kw, kb = jax.random.split(key, 4)

    x = jax.random.normal(kx, (B, C, N, 1), dtype=jnp.float32)
    # edge_index: [0] = neighbor ids (random), [1] = center ids (each node's own index, K-invariant)
    nbr = jax.random.randint(ke, (B, N, K), 0, N, dtype=jnp.int32)
    ctr = jnp.broadcast_to(jnp.arange(N, dtype=jnp.int32)[None, :, None], (B, N, K))
    edge_index = jnp.stack([nbr, ctr], axis=0)                 # (2, B, N, K)

    # deterministic params: Conv2d(2C, Cout, 1, groups=4, bias=True)
    weight = 0.1 * jax.random.normal(kw, (Cout, 2 * C // GROUPS, 1, 1), dtype=jnp.float32)
    bias = 0.05 * jax.random.normal(kb, (Cout,), dtype=jnp.float32)

    out = graph_conv2d_edge(x, edge_index, weight, bias)
    out = jax.block_until_ready(out)
    assert out.shape == (B, Cout, N, 1)

    # pure-JAX f32 reference, identical to the PyTorch module semantics
    x_i = batched_index_select(x, edge_index[1])
    x_j = batched_index_select(x, edge_index[0])
    feat = jnp.concatenate([x_i, x_j - x_i], axis=1)           # (B, 2C, N, K)
    w_bd = _fold_grouped_1x1(weight, GROUPS)
    y = jnp.einsum('bcnk,cd->bdnk', feat, w_bd) + bias[None, :, None, None]
    ref = jnp.max(jnp.maximum(y, 0.0), axis=-1, keepdims=True)

    # features/weights are streamed in bf16 -> compare with a bf16-appropriate tolerance
    assert jnp.allclose(out, ref, atol=3e-2, rtol=3e-2), float(jnp.max(jnp.abs(out - ref)))

    print("KERNEL_OK")
</pallas_src>

<mosaic_0001>
module attributes {stable_mosaic.version = 11 : i64} {
  func.func @edgeconv_kernel(%arg0: i32, %arg1: memref<16x8x128xbf16, #tpu.memory_space<vmem>>, %arg2: memref<16x128xbf16, #tpu.memory_space<vmem>>, %arg3: memref<128x128xbf16, #tpu.memory_space<vmem>>, %arg4: memref<128x128xbf16, #tpu.memory_space<vmem>>, %arg5: memref<1x128xf32, #tpu.memory_space<vmem>>, %arg6: memref<16x128xf32, #tpu.memory_space<vmem>>) attributes {dimension_semantics = [#tpu.dimension_semantics<parallel>], iteration_bounds = array<i64: 2>, scalar_prefetch = 0 : i64, scratch_operands = 0 : i64, tpu.core_type = #tpu.core_type<tc>, window_params = [{transform_indices = @transform_0, window_bounds = array<i64: 16, 8, 128>}, {transform_indices = @transform_1, window_bounds = array<i64: 16, 128>}, {pipeline_mode = #tpu.pipeline_mode<synchronous>, transform_indices = @transform_2, window_bounds = array<i64: 128, 128>}, {pipeline_mode = #tpu.pipeline_mode<synchronous>, transform_indices = @transform_3, window_bounds = array<i64: 128, 128>}, {pipeline_mode = #tpu.pipeline_mode<synchronous>, transform_indices = @transform_4, window_bounds = array<i64: 1, 128>}, {transform_indices = @transform_5, window_bounds = array<i64: 16, 128>}]} {
    %c0 = arith.constant 0 : index
    %c0_0 = arith.constant 0 : index
    %c0_1 = arith.constant 0 : index
    %0 = vector.load %arg1[%c0, %c0_0, %c0_1] : memref<16x8x128xbf16, #tpu.memory_space<vmem>>, vector<16x8x128xbf16>
    %1 = vector.shape_cast %0 : vector<16x8x128xbf16> to vector<128x128xbf16>
    %c0_2 = arith.constant 0 : index
    %c0_3 = arith.constant 0 : index
    %2 = vector.load %arg3[%c0_2, %c0_3] : memref<128x128xbf16, #tpu.memory_space<vmem>>, vector<128x128xbf16>
    %cst = arith.constant dense<0.000000e+00> : vector<128x128xf32>
    %3 = tpu.matmul %1, %2, %cst {dimension_numbers = #tpu.dot_dimension_numbers<[1], [0], [0], [1], [0, 0, 1, 1], [], []>} : vector<128x128xbf16>, vector<128x128xbf16>, vector<128x128xf32> -> vector<128x128xf32>
    %4 = vector.shape_cast %3 : vector<128x128xf32> to vector<16x8x128xf32>
    %cst_4 = arith.constant dense<0xFF800000> : vector<16x128xf32>
    %5 = vector.multi_reduction <maximumf>, %4, %cst_4 [1] : vector<16x8x128xf32> to vector<16x128xf32>
    %c0_5 = arith.constant 0 : index
    %c0_6 = arith.constant 0 : index
    %6 = vector.load %arg2[%c0_5, %c0_6] : memref<16x128xbf16, #tpu.memory_space<vmem>>, vector<16x128xbf16>
    %c0_7 = arith.constant 0 : index
    %c0_8 = arith.constant 0 : index
    %7 = vector.load %arg4[%c0_7, %c0_8] : memref<128x128xbf16, #tpu.memory_space<vmem>>, vector<128x128xbf16>
    %cst_9 = arith.constant dense<0.000000e+00> : vector<16x128xf32>
    %8 = tpu.matmul %6, %7, %cst_9 {dimension_numbers = #tpu.dot_dimension_numbers<[1], [0], [0], [1], [0, 0, 1, 1], [], []>} : vector<16x128xbf16>, vector<128x128xbf16>, vector<16x128xf32> -> vector<16x128xf32>
    %9 = arith.addf %8, %5 : vector<16x128xf32>
    %c0_10 = arith.constant 0 : index
    %c0_11 = arith.constant 0 : index
    %10 = vector.load %arg5[%c0_10, %c0_11] : memref<1x128xf32, #tpu.memory_space<vmem>>, vector<1x128xf32>
    %11 = vector.broadcast %10 : vector<1x128xf32> to vector<16x128xf32>
    %12 = arith.addf %9, %11 : vector<16x128xf32>
    %cst_12 = arith.constant 0.000000e+00 : f32
    %13 = vector.broadcast %cst_12 : f32 to vector<16x128xf32>
    %14 = arith.maximumf %12, %13 : vector<16x128xf32>
    %c0_13 = arith.constant 0 : index
    %c0_14 = arith.constant 0 : index
    %15 = vector.load %arg6[%c0_13, %c0_14] : memref<16x128xf32, #tpu.memory_space<vmem>>, vector<16x128xf32>
    tpu.vector_store %arg6[%c0_13, %c0_14], %14 {strides = array<i32>} : memref<16x128xf32, #tpu.memory_space<vmem>>, vector<16x128xf32>,
    return
  }
  func.func @transform_0(%arg0: i32) -> (i32, i32, i32) {
    %c0_i32 = arith.constant 0 : i32
    %c0_i32_0 = arith.constant 0 : i32
    %c0_i32_1 = arith.constant 0 : i32
    return %arg0, %c0_i32, %c0_i32_0 : i32, i32, i32
  }
  func.func @transform_1(%arg0: i32) -> (i32, i32) {
    %c0_i32 = arith.constant 0 : i32
    %c0_i32_0 = arith.constant 0 : i32
    return %arg0, %c0_i32 : i32, i32
  }
  func.func @transform_2(%arg0: i32) -> (i32, i32) {
    %c0_i32 = arith.constant 0 : i32
    %c0_i32_0 = arith.constant 0 : i32
    %c0_i32_1 = arith.constant 0 : i32
    return %c0_i32, %c0_i32_0 : i32, i32
  }
  func.func @transform_3(%arg0: i32) -> (i32, i32) {
    %c0_i32 = arith.constant 0 : i32
    %c0_i32_0 = arith.constant 0 : i32
    %c0_i32_1 = arith.constant 0 : i32
    return %c0_i32, %c0_i32_0 : i32, i32
  }
  func.func @transform_4(%arg0: i32) -> (i32, i32) {
    %c0_i32 = arith.constant 0 : i32
    %c0_i32_0 = arith.constant 0 : i32
    %c0_i32_1 = arith.constant 0 : i32
    return %c0_i32, %c0_i32_0 : i32, i32
  }
  func.func @transform_5(%arg0: i32) -> (i32, i32) {
    %c0_i32 = arith.constant 0 : i32
    %c0_i32_0 = arith.constant 0 : i32
    return %arg0, %c0_i32 : i32, i32
  }
}

</mosaic_0001>

<bundles_post_ra>
// kernel: tpu_custom_call.1
= control target key start
LH: loop header
LB: loop body
LE: loop exit
PB: predicated region body
PF: predicated region fallthrough
CT: control target
= control target key end

     0   :  { %s1735_s0 = inlined_call_operand.hbm [shape: bf16[32,8,128], index: 0, kind: input, shape index: {}]   ;;  %s1736_s1 = inlined_call_operand.hbm [shape: bf16[32,128], index: 1, kind: input, shape index: {}]   ;;  %s1737_s2 = inlined_call_operand.hbm [shape: bf16[128,128], index: 2, kind: input, shape index: {}]   ;;  %s1738_s3 = inlined_call_operand.hbm [shape: bf16[128,128], index: 3, kind: input, shape index: {}]   ;;  %s1739_s4 = inlined_call_operand.vmem [shape: f32[1,128], index: 4, kind: input, shape index: {}]   ;;  %s1740_s5 = inlined_call_operand.hbm [shape: f32[32,128], index: 5, kind: output, shape index: {}]  }
   0x1   :  { %1746 = sst [smem:[#allocation16_spill]] %s1735_s0 }
   0x2   :  { %1747 = sst [smem:[#allocation17_spill]] %s1737_s2 }
   0x3   :  { %1748 = sst [smem:[#allocation18_spill]] %s1738_s3 }
   0x4   :  { %10 = vsyncpa [#allocation3], 0 }
   0x5   :  { %12 = vsyncpa [#allocation3 + $0x1], 0 }
   0x6   :  { %13 = vsyncpa [#allocation6], 0 }
   0x7   :  { %15 = vsyncpa [#allocation6 + $0x1], 0 }
   0x8   :  { %16 = vsyncpa [#allocation9], 0 }
   0x9   :  { %17 = vsyncpa [#allocation4], 0 }
   0xa   :  { %19 = vsyncpa [#allocation4 + $0x1], 0  ;;  %s1399_s18 = smov 0   ;;  %s1401_s19 = smov 0  }
   0xb   :  { %s1403_s20 = smov 0   ;;  %s1405_s21 = smov 0  }
   0xc LB: > { %s1420_s22 = sadd.s32 4294967295, %s1356_s21   ;;  %s931_s23 = sadd.s32 4294967294, %s1356_s21   ;;  %s1356_s21 = sphi %s1405_s21, %s1772_s21   ;;  %s1352_s20 = sphi %s1403_s20, %s1771_s20   ;;  %s1348_s19 = sphi %s1401_s19, %s1770_s19   ;;  %s1344_s18 = sphi %s1399_s18, %s1769_s18  }
   0xd   : > { %p45_p0 = scmp.ne.s32.totalorder %s1348_s19, %s1344_s18  ;;  %p1741_p1 = scmp.eq.s32.totalorder %s1420_s22, 0 }
   0xe   : > { %p164_p3 = scmp.eq.s32.totalorder %s931_s23, 1  ;;  %p932_p5 = scmp.ge.s32.totalorder %s1356_s21, 1 }
   0xf   : > { %p1429_p4 = por %p1741_p1, %p45_p0  ;;  %p171_p7 = scmp.lt.s32.totalorder %s1356_s21, 3 }
  0x10   : > { %p1434_p6 = por %p164_p3, %p45_p0  ;;  %s1358_s27 = smov [#allocation7]  }
  0x11   : > { %s1749_s24 = scalar_select %p1429_p4, 1, 0 }
  0x12   : > { %s1750_s25 = scalar_select %p1434_p6, 1, 0 }
  0x13   : > { %p1439_p8 = pnand %p932_p5, %p171_p7  ;;  %s183_s28 = sshll.u32 %s1358_s27, 4  ;;  %s1443_s28 = int_to_ptr.vmem [resolvable:$true] %s183_s28 }
  0x14   : > { %s1359_s30 = smov [#allocation8]   ;;  %s1753_s2 = sld [smem:[#allocation17_spill]] }
  0x15   : > { %p1073_p9 = pneg %p1439_p8  ;;  %s196_s6 = sshll.u32 %s1359_s30, 4  ;;  %s1454_s6 = int_to_ptr.vmem [resolvable:$true] %s196_s6 }
  0x17   : > { %p1450_p11 = pnand %p1073_p9, %p1741_p1 }
  0x19   : > { %p1164_p13 = pneg %p1450_p11 }
  0x1a   : > { %s1162_s9 = scalar_lea.hbm %s1753_s2, 1024 }
  0x1b   : > { %p1163_p12 = scmp.ne.s32.totalorder %s1753_s2, %s1162_s9  ;;  %p1169_p5 = scmp.lt.u32.totalorder %s1162_s9, %s1753_s2 }
  0x1d   : > { %p1165_p0 = pnand %p1164_p13, %p1163_p12 }
  0x1f   : > { %p1166_p3 = pneg %p1165_p0 }
  0x21   : > { %p1171_p7 = pnand %p1169_p5, %p1166_p3 }
  0x23   : > { %1174 = shalt.err (!%p1171_p7)
}
  0x24   : > { %s1175_s14 = scalar_lea.vmem %s1443_s28, 1024  ;;  %p1183_p2 = scmp.lt.s32.totalorder %s1443_s28, %s1443_s28 }
  0x25   : > { %p1176_p9 = scmp.ne.s32.totalorder %s1443_s28, %s1175_s14  ;;  %p1184_p12 = scmp.lt.s32.totalorder %s1175_s14, %s1175_s14 }
  0x27   : > { %p1178_p10 = pnand %p1176_p9, %p1164_p13  ;;  %p1185_p0 = por %p1184_p12, %p1183_p2 }
  0x29   : > { %p1179_p1 = pneg %p1178_p10 }
  0x2b   : > { %p1186_p6 = pnand %p1185_p0, %p1179_p1 }
  0x2d   : > { %1189 = shalt.err (!%p1186_p6)
}
  0x2e   : > { %s1742_s15 = smov 64   ;;  %s1361_s16 = smov 4  }
  0x2f   : > { %1076 = dma.hbm_to_vmem [thread:$0]  (!%p1450_p11), %s1753_s2, 1024, %s1443_s28, [#allocation6], %s1742_s15, %s1742_s15, %s1361_s16  }
  0x30   : > { %s1754_s3 = sld [smem:[#allocation18_spill]] }
  0x36   : > { %s1190_s7 = scalar_lea.hbm %s1754_s3, 1024 }
  0x37   : > { %p1191_p1 = scmp.ne.s32.totalorder %s1754_s3, %s1190_s7  ;;  %p1197_p10 = scmp.lt.u32.totalorder %s1190_s7, %s1754_s3 }
  0x39   : > { %p1193_p2 = pnand %p1191_p1, %p1164_p13 }
  0x3b   : > { %p1194_p6 = pneg %p1193_p2 }
  0x3d   : > { %p1199_p3 = pnand %p1197_p10, %p1194_p6 }
  0x3f   : > { %1202 = shalt.err (!%p1199_p3)
}
  0x40   : > { %s1203_s28 = scalar_lea.vmem %s1454_s6, 1024  ;;  %p1211_p12 = scmp.lt.s32.totalorder %s1454_s6, %s1454_s6 }
  0x41   : > { %p1204_p5 = scmp.ne.s32.totalorder %s1454_s6, %s1203_s28  ;;  %p1212_p0 = scmp.lt.s32.totalorder %s1203_s28, %s1203_s28 }
  0x43   : > { %p1206_p7 = pnand %p1204_p5, %p1164_p13  ;;  %p1213_p1 = por %p1212_p0, %p1211_p12 }
  0x45   : > { %p1207_p9 = pneg %p1206_p7 }
  0x47   : > { %p1214_p2 = pnand %p1213_p1, %p1207_p9 }
  0x49   : > { %1217 = shalt.err (!%p1214_p2)
}
  0x4a   : > { %1079 = dma.hbm_to_vmem [thread:$0]  (!%p1450_p11), %s1754_s3, 1024, %s1454_s6, [#allocation9], %s1742_s15, %s1742_s15, %s1361_s16  }
  0x4b   : > { %s1515_s29 = sadd.s32 1, %s1356_s21   ;;  %s32_s14 = sadd.s32 1, %s1352_s20 }
  0x4c   : > { %s29_s17 = ssub.s32 %s1356_s21, %s1515_s29  ;;  %p39_p13 = scmp.ne.s32.totalorder %s1352_s20, %s1348_s19 }
  0x4d   : > { %p30_p6 = scmp.eq.s32.totalorder %s29_s17, 0  ;;  %p40_p10 = scmp.eq.s32.totalorder %s1356_s21, 0 }
  0x4e   : > { %p1755_p3 = scmp.eq.s32.totalorder %s1420_s22, 1  ;;  %p1093_p7 = scmp.lt.s32.totalorder %s1356_s21, 2 }
  0x4f   : > { %s1531_s27 = scalar_select %p30_p6, %s1352_s20, %s32_s14  }
  0x50   : > { %p1525_p5 = por %p1755_p3, %p39_p13  ;;  %p41_p9 = por %p40_p10, %p39_p13 }
  0x51   : > { %s1534_s30 = sand.u32 1, %s1352_s20   ;;  %s979_s7 = sshll.u32 %s1356_s21, 10 }
  0x52   : > { %s1756_s23 = scalar_select %p1525_p5, 1, 0 }
  0x53   : > { %s936_s6 = sshll.u32 %s1534_s30, 6  ;;  %s1757_s0 = sld [smem:[#allocation16_spill]] }
  0x54   : > { %s217_s11 = scalar_lea.vmem [#allocation2], %s936_s6  ;;  %p1545_p11 = pnand %p1093_p7, %p41_p9 }
  0x55   : > { %s224_s28 = sshll.u32 %s217_s11, 4  ;;  %s939_s14 = sshll.u32 %s1534_s30, 3  ;;  %s1543_s28 = int_to_ptr.vmem [resolvable:$true] %s224_s28 }
  0x56   : > { %s214_s17 = scalar_lea.sflag [#allocation3], %s1534_s30  ;;  %p1220_p0 = pneg %p1545_p11 }
  0x59   : > { %s1541_s10 = scalar_lea.hbm %s1757_s0, %s979_s7  ;;  %s1223_s9 = scalar_lea.hbm %s1757_s0, 2048 }
  0x5a   : > { %s1218_s8 = scalar_lea.hbm %s1541_s10, 1024  ;;  %p1224_p13 = scmp.lt.u32.totalorder %s1541_s10, %s1757_s0 }
  0x5b   : > { %p1219_p12 = scmp.ne.s32.totalorder %s1541_s10, %s1218_s8  ;;  %p1225_p6 = scmp.lt.u32.totalorder %s1223_s9, %s1218_s8 }
  0x5c   : > { %p1227_p3 = scmp.lt.u32.totalorder %s1218_s8, %s1541_s10 }
  0x5d   : > { %p1221_p1 = pnand %p1220_p0, %p1219_p12  ;;  %p1226_p10 = por %p1225_p6, %p1224_p13 }
  0x5f   : > { %p1222_p2 = pneg %p1221_p1  ;;  %p1228_p7 = por %p1227_p3, %p1226_p10 }
  0x61   : > { %p1229_p9 = pnand %p1228_p7, %p1222_p2 }
  0x63   : > { %1232 = shalt.err (!%p1229_p9)
}
  0x64   : > { %s1233_s13 = scalar_lea.vmem %s1543_s28, 1024  ;;  %s1362_s6 = smov [#allocation2]  }
  0x65   : > { %p1234_p12 = scmp.ne.s32.totalorder %s1543_s28, %s1233_s13  ;;  %s1238_s7 = sshll.u32 %s1362_s6, 4  ;;  %s1239_s7 = int_to_ptr.vmem [resolvable:$false] %s1238_s7 }
  0x66   : > { %s1240_s15 = scalar_lea.vmem %s1239_s7, 2048  ;;  %p1241_p4 = scmp.lt.s32.totalorder %s1543_s28, %s1239_s7 }
  0x67   : > { %p1236_p1 = pnand %p1234_p12, %p1220_p0  ;;  %p1242_p13 = scmp.lt.s32.totalorder %s1240_s15, %s1233_s13 }
  0x69   : > { %p1237_p5 = pneg %p1236_p1  ;;  %p1243_p6 = por %p1242_p13, %p1241_p4 }
  0x6b   : > { %p1244_p10 = pnand %p1243_p6, %p1237_p5 }
  0x6d   : > { %1247 = shalt.err (!%p1244_p10)
}
  0x6e   : > { %s1759_s8 = smov 64   ;;  %s980_s9 = sshll.u32 %s1356_s21, 7 }
  0x6f   : > { %1083 = dma.hbm_to_vmem [thread:$0]  (!%p1545_p11), %s1541_s10, 1024, %s1543_s28, %s214_s17, %s1759_s8, %s1759_s8, %s1361_s16  }
  0x70   : > { %s1586_s6 = scalar_lea.hbm %s1736_s1, %s980_s9  ;;  %s238_s7 = scalar_lea.vmem [#allocation5], %s939_s14 }
  0x71   : > { %s245_s15 = sshll.u32 %s238_s7, 4  ;;  %s1760_s0 = sand.u32 1, %s1356_s21   ;;  %s1590_s15 = int_to_ptr.vmem [resolvable:$true] %s245_s15 }
  0x72   : > { %s1594_s2 = scalar_lea.sflag [#allocation6], %s1760_s0  ;;  %s1248_s3 = scalar_lea.hbm %s1586_s6, 128 }
  0x73   : > { %p1249_p4 = scmp.ne.s32.totalorder %s1586_s6, %s1248_s3  ;;  %s1253_s30 = scalar_lea.hbm %s1736_s1, 256 }
  0x74   : > { %p1254_p3 = scmp.lt.u32.totalorder %s1586_s6, %s1736_s1  ;;  %p1255_p7 = scmp.lt.u32.totalorder %s1253_s30, %s1248_s3 }
  0x75   : > { %p1251_p5 = pnand %p1249_p4, %p1220_p0  ;;  %p1257_p12 = scmp.lt.u32.totalorder %s1248_s3, %s1586_s6 }
  0x76   : > { %p1256_p9 = por %p1255_p7, %p1254_p3 }
  0x77   : > { %p1252_p2 = pneg %p1251_p5 }
  0x78   : > { %p1258_p1 = por %p1257_p12, %p1256_p9 }
  0x7a   : > { %p1259_p13 = pnand %p1258_p1, %p1252_p2 }
  0x7c   : > { %1262 = shalt.err (!%p1259_p13)
}
  0x7d   : > { %s1263_s0 = scalar_lea.vmem %s1590_s15, 128  ;;  %s1363_s14 = smov [#allocation5]  }
  0x7e   : > { %p1264_p6 = scmp.ne.s32.totalorder %s1590_s15, %s1263_s0  ;;  %s1268_s11 = sshll.u32 %s1363_s14, 4  ;;  %s1269_s11 = int_to_ptr.vmem [resolvable:$false] %s1268_s11 }
  0x7f   : > { %s1270_s13 = scalar_lea.vmem %s1269_s11, 256  ;;  %p1271_p5 = scmp.lt.s32.totalorder %s1590_s15, %s1269_s11 }
  0x80   : > { %p1266_p10 = pnand %p1264_p6, %p1220_p0  ;;  %p1272_p3 = scmp.lt.s32.totalorder %s1270_s13, %s1263_s0 }
  0x82   : > { %p1267_p4 = pneg %p1266_p10  ;;  %p1273_p7 = por %p1272_p3, %p1271_p5 }
  0x84   : > { %p1274_p9 = pnand %p1273_p7, %p1267_p4 }
  0x86   : > { %1277 = shalt.err (!%p1274_p9)
}
  0x87   : > { %1086 = dma.hbm_to_vmem [thread:$0]  (!%p1545_p11), %s1586_s6, 128, %s1590_s15, %s1594_s2, %s1759_s8, %s1759_s8, %s1361_s16  }
  0x88   : > { %257 = sbr.rel (%p1439_p8) target bundleno = 462 (0x1ce), region = 40  ;;  %s1626_s3 = sand.u32 (!%p1439_p8), 1, %s1348_s19  }
  0x89   : > { %s943_s7 = sshll.u32 (!%p1439_p8), %s1626_s3, 6  ;;  %s260_s10 = scalar_lea.sflag (!%p1439_p8), [#allocation3], %s1626_s3 }
  0x8a   : > { %s1630_s28 = scalar_lea.vmem (!%p1439_p8), [#allocation2], %s943_s7  ;;  %p1761_p0 = scmp.ne.s32.totalorder (!%p1439_p8), %s1749_s24, 0 }
  0x8f   : > { %1323 = dma.done.wait (%p1761_p0), %s260_s10, 1024  }
  0x90   : > { %1325 = vsyncadd (%p1761_p0), %s260_s10, 4294966272  ;;  %s268_s2 = sand.u32 1, %s1420_s22   ;;  %s944_s26 = sshll.u32 %s1626_s3, 3 }
  0x91   : > { %s269_s16 = scalar_lea.sflag [#allocation6], %s268_s2  ;;  %s1638_s12 = scalar_lea.vmem [#allocation5], %s944_s26 }
  0x92   : > { %1327 = dma.done.wait (%p1761_p0), %s269_s16, 128  }
  0x93   : > { %1329 = vsyncadd (%p1761_p0), %s269_s16, 4294967168  ;;  %p1762_p8 = scmp.eq.s32.totalorder %s1420_s22, 0 }
  0x95   : > { %1331 = dma.done.wait (%p1762_p8), [#allocation6], 1024   ;;  %p1763_p11 = pmov %p1762_p8 }
  0x96   : > { %p1764_p2 = pmov %p1762_p8 }
  0x97   : > { %1333 = vsyncadd (%p1763_p11), [#allocation6], 4294966272 }
  0x98   : > { %1335 = dma.done.wait (%p1764_p2), [#allocation9], 1024   ;;  %p1765_p12 = pmov %p1764_p2 }
  0x99   : > { %v1364_v0 = vmov 0.0   ;;  %vm1365_vm0 = vmmov 0   ;;  %v1137_v1 = vld [vmem:[#allocation7] sm:$0xff]   ;;  %v1138_v2 = vld [vmem:[#allocation7 + $0x8] sm:$0xff]   ;;  %v1139_v3 = vld [vmem:[#allocation7 + $0x10] sm:$0xff]   ;;  %vm725_vm1 = vcmask 1041409  }
  0x9a   : > { %1337 = vsyncadd (%p1765_p12), [#allocation9], 4294966272  ;;  %1039 = vmatprep.subr.bf16.mxu1 %v1364_v0  ;;  %1055 = vmatprep.mubr.msk.bf16.mxu1 %vm1365_vm0, %v1364_v0  ;;  %v1144_v4 = vld [vmem:[#allocation8] sm:$0xff]   ;;  %v1140_v5 = vld [vmem:[#allocation7 + $0x18] sm:$0xff]   ;;  %vm727_vm2 = vcmask 1042434   ;;  %vm729_vm3 = vcmask 1043459  }
  0x9b   : > { %1007 = vmatprep.subr.bf16.mxu0 %v1137_v1  ;;  %1040 = vmatpush3.bf16.msra.mxu1 %v1144_v4  ;;  %v1146_v6 = vld [vmem:[%s1630_s28] sm:$0xff]   ;;  %v1147_v7 = vld [vmem:[#allocation8 + $0x8] sm:$0xff]   ;;  %v1141_v8 = vld [vmem:[#allocation7 + $0x20] sm:$0xff]   ;;  %vm731_vm4 = vcmask 1044484   ;;  %vm733_vm5 = vcmask 1045509   ;;  %vm735_vm6 = vcmask 1046534  }
  0x9c   : > { %1008 = vmatpush3.bf16.msra.mxu0 %v1137_v1  ;;  %1041 = vmatprep.subr.bf16.mxu1 %v1364_v0  ;;  %v1149_v9 = vld [vmem:[#allocation8 + $0x10] sm:$0xff]   ;;  %v1142_v10 = vld [vmem:[#allocation7 + $0x28] sm:$0xff]   ;;  %v1151_v11 = vld [vmem:[#allocation8 + $0x18] sm:$0xff]   ;;  %vm737_vm7 = vcmask 1047559   ;;  %s947_s6 = sshll.u32 %s1626_s3, 4  ;;  %s981_s17 = sshll.u32 %s1420_s22, 8 }
  0x9d   : > { %1009 = vmatprep.subr.bf16.mxu0 %v1138_v2  ;;  %1023 = vmatprep.mubr.bf16.mxu0 %v1146_v6  ;;  %v1143_v12 = vld [vmem:[#allocation7 + $0x30] sm:$0xff]   ;;  %v1153_v13 = vld [vmem:[#allocation8 + $0x20] sm:$0xff]   ;;  %v1145_v14 = vld [vmem:[#allocation7 + $0x38] sm:$0xff]   ;;  %s311_s15 = scalar_lea.vmem [#allocation10], %s947_s6  ;;  %s1691_s14 = scalar_lea.hbm %s1740_s5, %s981_s17 }
  0x9e   : > { %v1155_v15 = vld [vmem:[#allocation8 + $0x28] sm:$0xff]   ;;  %v1157_v16 = vld [vmem:[#allocation8 + $0x30] sm:$0xff]   ;;  %v1148_v17 = vld [vmem:[%s1630_s28 + $0x8] sm:$0xff]   ;;  %s816_s30 = sshll.u32 %s311_s15, 4  ;;  %s803_s11 = scalar_lea.sflag [#allocation4], %s1626_s3  ;;  %s1686_s30 = int_to_ptr.vmem [resolvable:$true] %s816_s30 }
  0x9f   : > { %1042 = vmatpush3.bf16.msra.mxu1 %v1147_v7  ;;  %v1150_v18 = vld [vmem:[%s1630_s28 + $0x10] sm:$0xff]   ;;  %v1159_v19 = vld [vmem:[#allocation8 + $0x38] sm:$0xff]   ;;  %v1152_v21 = vld [vmem:[%s1630_s28 + $0x18] sm:$0xff]   ;;  %s1278_s13 = scalar_lea.vmem %s1686_s30, 256  ;;  %p1766_p13 = scmp.ne.s32.totalorder %s1756_s23, 0 }
  0xa0   : > { %1010 = vmatpush3.bf16.msra.mxu0 %v1138_v2  ;;  %1043 = vmatprep.subr.bf16.mxu1 %v1364_v0  ;;  %v1161_v20 = vld [vmem:[%s1638_s12] sm:$0xff]   ;;  %v1158_v24 = vld [vmem:[%s1630_s28 + $0x30] sm:$0xff]   ;;  %v1160_v25 = vld [vmem:[%s1630_s28 + $0x38] sm:$0xff]   ;;  %p1279_p1 = scmp.ne.s32.totalorder %s1686_s30, %s1278_s13  ;;  %s1366_s22 = smov [#allocation10]  }
  0xa1   : > { %1011 = vmatprep.subr.bf16.mxu0 %v1139_v3  ;;  %v1154_v22 = vld [vmem:[%s1630_s28 + $0x20] sm:$0xff]   ;;  %v1156_v23 = vld [vmem:[%s1630_s28 + $0x28] sm:$0xff]   ;;  %s1282_s7 = sshll.u32 %s1366_s22, 4  ;;  %s1283_s7 = int_to_ptr.vmem [resolvable:$false] %s1282_s7 }
  0xa2   : > { %p1280_p6 = pnand %p1279_p1, %p1766_p13  ;;  %s1284_s10 = scalar_lea.vmem %s1283_s7, 512 }
  0xa3   : > { %1044 = vmatpush3.bf16.msra.mxu1 %v1149_v9  ;;  %p1285_p4 = scmp.lt.s32.totalorder %s1686_s30, %s1283_s7  ;;  %p1286_p5 = scmp.lt.s32.totalorder %s1284_s10, %s1278_s13 }
  0xa4   : > { %1012 = vmatpush3.bf16.msra.mxu0 %v1139_v3  ;;  %1045 = vmatprep.subr.bf16.mxu1 %v1364_v0  ;;  %p1281_p10 = pneg %p1280_p6 }
  0xa5   : > { %1013 = vmatprep.subr.bf16.mxu0 %v1140_v5  ;;  %p1287_p3 = por %p1286_p5, %p1285_p4 }
  0xa7   : > { %1046 = vmatpush3.bf16.msra.mxu1 %v1151_v11  ;;  %p1288_p7 = pnand %p1287_p3, %p1281_p10 }
  0xa8   : > { %1014 = vmatpush3.bf16.msra.mxu0 %v1140_v5  ;;  %1047 = vmatprep.subr.bf16.mxu1 %v1364_v0 }
  0xa9   : > { %1015 = vmatprep.subr.bf16.mxu0 %v1141_v8 }
  0xab   : > { %1048 = vmatpush3.bf16.msra.mxu1 %v1153_v13 }
  0xac   : > { %1016 = vmatpush3.bf16.msra.mxu0 %v1141_v8  ;;  %1049 = vmatprep.subr.bf16.mxu1 %v1364_v0 }
  0xad   : > { %1017 = vmatprep.subr.bf16.mxu0 %v1142_v10 }
  0xaf   : > { %1050 = vmatpush3.bf16.msra.mxu1 %v1155_v15 }
  0xb0   : > { %1018 = vmatpush3.bf16.msra.mxu0 %v1142_v10  ;;  %1051 = vmatprep.subr.bf16.mxu1 %v1364_v0 }
  0xb1   : > { %1019 = vmatprep.subr.bf16.mxu0 %v1143_v12 }
  0xb3   : > { %1052 = vmatpush3.bf16.msra.mxu1 %v1157_v16 }
  0xb4   : > { %1020 = vmatpush3.bf16.msra.mxu0 %v1143_v12  ;;  %1053 = vmatprep.subr.bf16.mxu1 %v1364_v0 }
  0xb5   : > { %1021 = vmatprep.subr.bf16.mxu0 %v1145_v14 }
  0xb7   : > { %1054 = vmatpush3.bf16.msra.mxu1 %v1159_v19 }
  0xb8   : > { %1022 = vmatpush3.bf16.msra.mxu0 %v1145_v14 }
  0xba   : > { %1056 = vmatmul.mubr.bf16.vlgmr.msra.gmra.mrb[0].mxu1 %v1161_v20 }
  0xbb   : > { %1024 = vmatmul.mubr.bf16.vlgmr.msra.gmra.mrb[0].mxu0 %v1148_v17 }
  0xbc   : > { %1027 = vmatprep.mubr.bf16.mxu0 %v1150_v18 }
  0xc3   : > { %1028 = vmatmul.mubr.bf16.gmra.mrb[4].mxu0 %v1152_v21 }
  0xc4   : > { %1031 = vmatprep.mubr.bf16.mxu0 %v1154_v22 }
  0xcb   : > { %1032 = vmatmul.mubr.bf16.gmra.mrb[8].mxu0 %v1156_v23 }
  0xcc   : > { %1035 = vmatprep.mubr.bf16.mxu0 %v1158_v24 }
  0xd3   : > { %1036 = vmatmul.mubr.bf16.gmra.mrb[12].mxu0 %v1160_v25 }
 0x18d   : > { %v1661_v40 = vpop.f32.mrb[0].mxu1 }
 0x18e   : > { %v1025_v26 = vpop.f32.mrb[0].mxu0  ;;  %v1057_v43 = vpop.f32.mrb[1].mxu1 }
 0x18f   : > { %v553_v27 = vrot.slane %v1025_v26, 4  ;;  %v478_v28 = vpop.f32.mrb[1].mxu0  ;;  %v1663_v47 = vpop.f32.mrb[2].mxu1 }
 0x190   : > { %v541_v29 = vrot.slane %v478_v28, 4  ;;  %v1026_v30 = vpop.f32.mrb[2].mxu0  ;;  %v1058_v51 = vpop.f32.mrb[3].mxu1 }
 0x191   : > { %v554_v31 = vmax.f32 %v1025_v26, %v553_v27  ;;  %v559_v32 = vrot.slane %v1026_v30, 4  ;;  %v481_v33 = vpop.f32.mrb[3].mxu0 }
 0x192   : > { %v542_v34 = vmax.f32 %v478_v28, %v541_v29  ;;  %v547_v35 = vrot.slane %v481_v33, 4 }
 0x193   : > { %v555_v36 = vrot.slane %v554_v31, 2  ;;  %v560_v37 = vmax.f32 %v1026_v30, %v559_v32 }
 0x194   : > { %v543_v38 = vrot.slane %v542_v34, 2  ;;  %v548_v39 = vmax.f32 %v481_v33, %v547_v35 }
 0x195   : > { %v556_v41 = vmax.f32 %v554_v31, %v555_v36  ;;  %v561_v42 = vrot.slane %v560_v37, 2 }
 0x196   : > { %v544_v44 = vmax.f32 %v542_v34, %v543_v38  ;;  %v549_v45 = vrot.slane %v548_v39, 2  ;;  %v1029_v46 = vpop.f32.mrb[4].mxu0 }
 0x197   : > { %v562_v48 = vmax.f32 %v560_v37, %v561_v42  ;;  %v577_v49 = vrot.slane %v1029_v46, 4  ;;  %v494_v50 = vpop.f32.mrb[5].mxu0  ;;  %v557_v56 = vrot.slane %v556_v41, 1 }
 0x198   : > { %v545_v52 = vrot.slane %v544_v44, 1  ;;  %v550_v53 = vmax.f32 %v548_v39, %v549_v45  ;;  %v565_v54 = vrot.slane %v494_v50, 4  ;;  %v1030_v55 = vpop.f32.mrb[6].mxu0 }
 0x199   : > { %v578_v57 = vmax.f32 %v1029_v46, %v577_v49  ;;  %v583_v58 = vrot.slane %v1030_v55, 4  ;;  %v497_v59 = vpop.f32.mrb[7].mxu0  ;;  %v563_v60 = vrot.slane %v562_v48, 1  ;;  %v558_v6 = vmax.f32 %v556_v41, %v557_v56 }
 0x19a   : > { %v551_v61 = vrot.slane %v550_v53, 1  ;;  %v566_v62 = vmax.f32 %v494_v50, %v565_v54  ;;  %v571_v63 = vrot.slane %v497_v59, 4  ;;  %v546_v2 = vmax.f32 %v544_v44, %v545_v52 }
 0x19b   : > { %v579_v0 = vrot.slane %v578_v57, 2  ;;  %v584_v1 = vmax.f32 %v1030_v55, %v583_v58  ;;  %v564_v9 = vmax.f32 %v562_v48, %v563_v60 }
 0x19c   : > { %v552_v3 = vmax.f32 %v550_v53, %v551_v61  ;;  %v567_v4 = vrot.slane %v566_v62, 2  ;;  %v572_v5 = vmax.f32 %v497_v59, %v571_v63  ;;  %v973_v61 = vld [vmem:[%s1739_s4] ss:$0 sm:$0xff] }
 0x19d   : > { %v580_v7 = vmax.f32 %v578_v57, %v579_v0  ;;  %v585_v8 = vrot.slane %v584_v1, 2 }
 0x19e   : > { %v726_v10 = vsel %vm725_vm1, %v552_v3, %v546_v2  ;;  %v568_v11 = vmax.f32 %v566_v62, %v567_v4  ;;  %v573_v12 = vrot.slane %v572_v5, 2  ;;  %v1033_v13 = vpop.f32.mrb[8].mxu0 }
 0x19f   : > { %v728_v14 = vsel %vm727_vm2, %v558_v6, %v726_v10  ;;  %v586_v15 = vmax.f32 %v584_v1, %v585_v8  ;;  %v601_v16 = vrot.slane %v1033_v13, 4  ;;  %v510_v17 = vpop.f32.mrb[9].mxu0  ;;  %v581_v23 = vrot.slane %v580_v7, 1 }
 0x1a0   : > { %v569_v18 = vrot.slane %v568_v11, 1  ;;  %v574_v19 = vmax.f32 %v572_v5, %v573_v12  ;;  %v589_v20 = vrot.slane %v510_v17, 4  ;;  %v1034_v21 = vpop.f32.mrb[10].mxu0  ;;  %v730_v22 = vsel %vm729_vm3, %v564_v9, %v728_v14 }
 0x1a1   : > { %v587_v24 = vrot.slane %v586_v15, 1  ;;  %v602_v25 = vmax.f32 %v1033_v13, %v601_v16  ;;  %v607_v26 = vrot.slane %v1034_v21, 4  ;;  %v513_v27 = vpop.f32.mrb[11].mxu0  ;;  %v582_v38 = vmax.f32 %v580_v7, %v581_v23 }
 0x1a2   : > { %v570_v28 = vmax.f32 %v568_v11, %v569_v18  ;;  %v575_v29 = vrot.slane %v574_v19, 1  ;;  %v590_v30 = vmax.f32 %v510_v17, %v589_v20  ;;  %v595_v31 = vrot.slane %v513_v27, 4 }
 0x1a3   : > { %v603_v32 = vrot.slane %v602_v25, 2  ;;  %v608_v33 = vmax.f32 %v1034_v21, %v607_v26  ;;  %v588_v42 = vmax.f32 %v586_v15, %v587_v24 }
 0x1a4   : > { %v576_v34 = vmax.f32 %v574_v19, %v575_v29  ;;  %v591_v35 = vrot.slane %v590_v30, 2  ;;  %v596_v36 = vmax.f32 %v513_v27, %v595_v31  ;;  %v732_v37 = vsel %vm731_vm4, %v570_v28, %v730_v22 }
 0x1a5   : > { %v604_v39 = vmax.f32 %v602_v25, %v603_v32  ;;  %v609_v41 = vrot.slane %v608_v33, 2 }
 0x1a6   : > { %v592_v43 = vmax.f32 %v590_v30, %v591_v35  ;;  %v597_v44 = vrot.slane %v596_v36, 2  ;;  %v1037_v45 = vpop.f32.mrb[12].mxu0  ;;  %v734_v46 = vsel %vm733_vm5, %v576_v34, %v732_v37 }
 0x1a7   : > { %v610_v48 = vmax.f32 %v608_v33, %v609_v41  ;;  %v625_v49 = vrot.slane %v1037_v45, 4  ;;  %v526_v50 = vpop.f32.mrb[13].mxu0  ;;  %v736_v51 = vsel %vm735_vm6, %v582_v38, %v734_v46  ;;  %v605_v57 = vrot.slane %v604_v39, 1 }
 0x1a8   : > { %v593_v52 = vrot.slane %v592_v43, 1  ;;  %v598_v53 = vmax.f32 %v596_v36, %v597_v44  ;;  %v613_v54 = vrot.slane %v526_v50, 4  ;;  %v1038_v55 = vpop.f32.mrb[14].mxu0  ;;  %v738_v56 = vsel %vm737_vm7, %v588_v42, %v736_v51 }
 0x1a9   : > { %v611_v58 = vrot.slane %v610_v48, 1  ;;  %v626_v59 = vmax.f32 %v1037_v45, %v625_v49  ;;  %v631_v60 = vrot.slane %v1038_v55, 4  ;;  %v529_v62 = vpop.f32.mrb[15].mxu0  ;;  %v783_v1 = vadd.f32 %v1661_v40, %v738_v56 }
 0x1aa   : > { %v599_v63 = vrot.slane %v598_v53, 1  ;;  %v614_v0 = vmax.f32 %v526_v50, %v613_v54  ;;  %v619_v4 = vrot.slane %v529_v62, 4  ;;  %v594_v5 = vmax.f32 %v592_v43, %v593_v52 }
 0x1ab   : > { %v627_v2 = vrot.slane %v626_v59, 2  ;;  %v632_v3 = vmax.f32 %v1038_v55, %v631_v60  ;;  %v796_v8 = vadd.f32 %v973_v61, %v783_v1  ;;  %v606_v9 = vmax.f32 %v604_v39, %v605_v57 }
 0x1ac   : > { %v600_v6 = vmax.f32 %v598_v53, %v599_v63  ;;  %v615_v7 = vrot.slane %v614_v0, 2  ;;  %v612_v10 = vmax.f32 %v610_v48, %v611_v58  ;;  %v620_v12 = vmax.f32 %v529_v62, %v619_v4 }
 0x1ad   : > { %v633_v11 = vrot.slane %v632_v3, 2  ;;  %v628_v14 = vmax.f32 %v626_v59, %v627_v2  ;;  %v798_v16 = vmax.f32 %v796_v8, 0.0 }
 0x1ae   : > { %v739_v13 = vsel %vm725_vm1, %v600_v6, %v594_v5  ;;  %v616_v15 = vmax.f32 %v614_v0, %v615_v7  ;;  %v621_v40 = vrot.slane %v620_v12, 2 }
 0x1af   : > { %v740_v17 = vsel %vm727_vm2, %v606_v9, %v739_v13  ;;  %v634_v18 = vmax.f32 %v632_v3, %v633_v11  ;;  %800 = vst [vmem:[%s311_s15] sm:$0xff] %v798_v16  ;;  %v629_v22 = vrot.slane %v628_v14, 1 }
 0x1b0   : > { %v617_v19 = vrot.slane %v616_v15, 1  ;;  %v741_v20 = vsel %vm729_vm3, %v612_v10, %v740_v17  ;;  %v622_v21 = vmax.f32 %v620_v12, %v621_v40 }
 0x1b1   : > { %v635_v24 = vrot.slane %v634_v18, 1  ;;  %v630_v28 = vmax.f32 %v628_v14, %v629_v22 }
 0x1b2   : > { %v618_v23 = vmax.f32 %v616_v15, %v617_v19  ;;  %v623_v25 = vrot.slane %v622_v21, 1 }
 0x1b3   : > { %v636_v29 = vmax.f32 %v634_v18, %v635_v24 }
 0x1b4   : > { %v742_v26 = vsel %vm731_vm4, %v618_v23, %v741_v20  ;;  %v624_v27 = vmax.f32 %v622_v21, %v623_v25 }
 0x1b6   : > { %v743_v30 = vsel %vm733_vm5, %v624_v27, %v742_v26 }
 0x1b7   : > { %v744_v31 = vsel %vm735_vm6, %v630_v28, %v743_v30 }
 0x1b8   : > { %v745_v32 = vsel %vm737_vm7, %v636_v29, %v744_v31 }
 0x1b9   : > { %v786_v33 = vadd.f32 %v1663_v47, %v745_v32 }
 0x1bb   : > { %v797_v34 = vadd.f32 %v973_v61, %v786_v33 }
 0x1bd   : > { %v799_v35 = vmax.f32 %v797_v34, 0.0 }
 0x1bf   : > { %801 = vst [vmem:[%s311_s15 + $0x8] sm:$0xff] %v799_v35 }
 0x1c0   : > { %1291 = shalt.err (!%p1288_p7)
}
 0x1c1   : > { %s1292_s28 = scalar_lea.hbm %s1691_s14, 256  ;;  %s1296_s16 = scalar_lea.hbm %s1740_s5, 512 }
 0x1c2   : > { %p1293_p9 = scmp.ne.s32.totalorder %s1691_s14, %s1292_s28  ;;  %p1297_p11 = scmp.lt.u32.totalorder %s1691_s14, %s1740_s5 }
 0x1c3   : > { %p1298_p2 = scmp.lt.u32.totalorder %s1296_s16, %s1292_s28  ;;  %p1300_p1 = scmp.lt.u32.totalorder %s1292_s28, %s1691_s14 }
 0x1c4   : > { %p1294_p0 = pnand %p1293_p9, %p1766_p13 }
 0x1c5   : > { %p1299_p12 = por %p1298_p2, %p1297_p11 }
 0x1c6   : > { %p1295_p8 = pneg %p1294_p0 }
 0x1c7   : > { %p1301_p6 = por %p1300_p1, %p1299_p12 }
 0x1c9   : > { %p1302_p10 = pnand %p1301_p6, %p1295_p8 }
 0x1cb   : > { %1305 = shalt.err (!%p1302_p10)
}
 0x1cc   : > { %s1367_s8 = smov 128   ;;  %s1368_s6 = smov 8  }
 0x1cd   : > { %1071 = dma.vmem_to_hbm [thread:$0]  (%p1766_p13), %s1686_s30, 256, %s1691_s14, %s803_s11, %s1367_s8, %s1367_s8, %s1368_s6  }
 0x1ce PF: > { %s831_s15 = sand.u32 1, %s1344_s18   ;;  %p1767_p4 = scmp.ne.s32.totalorder %s1750_s25, 0 }
 0x1cf   : > { %p1768_p5 = scmp.ge.s32.totalorder %s1356_s21, 2  ;;  %s832_s17 = scalar_lea.sflag [#allocation4], %s831_s15 }
 0x1d1   : > { %p1088_p3 = pnand %p1768_p5, %p1767_p4 }
 0x1d3   : > { %1339 = dma.done.wait (!%p1088_p3), %s832_s17, 256  }
 0x1d4   : > { %1341 = vsyncadd (!%p1088_p3), %s832_s17, 4294967040  ;;  %p22_p7 = scmp.ge.s32.totalorder %s1515_s29, 4   ;;  %s1769_s18 = smov %s1348_s19 }
 0x1d5   : > { %s1770_s19 = smov %s1352_s20  ;;  %s1771_s20 = smov %s1531_s27 }
 0x1d6   : > { %s1772_s21 = smov %s1515_s29  ;;  %24 = sbr.rel (!%p22_p7) target bundleno = 12 (0xc), region = 106 }
 0x1dd   :  { %837 = vsyncpa [#allocation3], 1 }
 0x1de   :  { %839 = vsyncpa [#allocation3 + $0x1], 1 }
 0x1df   :  { %840 = vsyncpa [#allocation6], 1 }
 0x1e0   :  { %842 = vsyncpa [#allocation6 + $0x1], 1 }
 0x1e1   :  { %843 = vsyncpa [#allocation9], 1 }
 0x1e2   :  { %844 = vsyncpa [#allocation4], 1 }
 0x1e3   :  { %846 = vsyncpa [#allocation4 + $0x1], 1 }

</bundles_post_ra>
